<compile_context>
chip_gen: v5e
topology: v5e:2x2
jax: 0.10.0
libtpu: 0.0.40
codegen_flags: <defaults>
</compile_context>

<pallas_src>
import functools

import jax
import jax.numpy as jnp
from jax.experimental import pallas as pl
from jax.experimental.pallas import tpu as pltpu


def _round_up(x, m):
    return (x + m - 1) // m * m


def _mlp_kernel(*refs, n_layers):
    """Fused MLP on one row tile: L1 -> PReLU -> L2 -> ... -> Ln.

    refs layout: x_ref, (w0, b0), (w1, b1), ..., alpha_ref (SMEM), o_ref.
    """
    x_ref = refs[0]
    wb_refs = refs[1:1 + 2 * n_layers]
    alpha_ref = refs[1 + 2 * n_layers]
    o_ref = refs[2 + 2 * n_layers]

    h = x_ref[...]  # bf16 (tile, pF_in)
    for layer in range(n_layers):
        w_ref = wb_refs[2 * layer]
        b_ref = wb_refs[2 * layer + 1]
        # MXU matmul with bf16 inputs, f32 accumulation.
        acc = jnp.dot(h, w_ref[...], preferred_element_type=jnp.float32)
        acc = acc + b_ref[...]  # (tile, pF_out) + (1, pF_out), f32 epilogue
        if layer < n_layers - 1:
            a = alpha_ref[0]  # scalar PReLU slope from SMEM
            acc = jnp.where(acc > 0, acc, a * acc)
            # TODO(synk): dropout is identity here (eval mode); a training-mode
            # mask would use pltpu.prng_random_bits + 1/(1-p) scaling.
            h = acc.astype(jnp.bfloat16)  # bf16 back onto the MXU path
        else:
            o_ref[...] = acc.astype(o_ref.dtype)


def feedforward_net(x, params, alpha, n_layers, *, tile_n=256):
    """Forward pass of FeedForwardNet (dropout in eval mode = identity).

    x:      (N, in_feats) float32
    params: list of (W, b) with W shape (fi, fo), b shape (fo,)
    alpha:  (1,) float32 shared PReLU slope
    """
    assert len(params) == n_layers
    N, f_in = x.shape
    f_out = params[-1][0].shape[1]
    LANE = 128

    # Row tiling: large 8-aligned tiles, N padded to a tile multiple so there
    # is no divisibility requirement on the caller's N.
    tile = min(tile_n, _round_up(N, 8))
    n_pad = _round_up(N, tile)

    # --- Pad + cast operands once (outside the kernel) ---------------------
    pf_in = _round_up(f_in, LANE)
    xp = jnp.zeros((n_pad, pf_in), jnp.bfloat16).at[:N, :f_in].set(
        x.astype(jnp.bfloat16))

    flat_args = [xp]
    wb_specs = []
    flops = 0
    bytes_accessed = xp.size * xp.dtype.itemsize
    prev = pf_in
    for (w, b) in params:
        fi, fo = w.shape
        pfi, pfo = _round_up(fi, LANE), _round_up(fo, LANE)
        assert pfi == prev, "consecutive layer dims must chain"
        wp = jnp.zeros((pfi, pfo), jnp.bfloat16).at[:fi, :fo].set(
            w.astype(jnp.bfloat16))
        bp = jnp.zeros((1, pfo), jnp.float32).at[0, :fo].set(b)
        flat_args += [wp, bp]
        # Constant index_map: weights/bias stay resident in VMEM across the
        # whole row-tile grid (no per-step re-fetch).  On v7x (64 MiB VMEM)
        # very large hidden dims would additionally want single-buffering or
        # K-tiling of the weight block.
        wb_specs += [
            pl.BlockSpec((pfi, pfo), lambda i: (0, 0)),
            pl.BlockSpec((1, pfo), lambda i: (0, 0)),
        ]
        flops += 2 * n_pad * pfi * pfo
        bytes_accessed += wp.size * wp.dtype.itemsize + bp.size * bp.dtype.itemsize
        prev = pfo
    pf_out = prev
    flat_args.append(alpha)
    bytes_accessed += n_pad * pf_out * 4

    # VMEM budget estimate (pipeline double-buffers each block).
    vmem_need = 2 * (tile * pf_in * 2
                     + sum(a.size * a.dtype.itemsize for a in flat_args[1:-1])
                     + tile * pf_out * 4) + (2 << 20)
    vmem_limit = int(min(max(vmem_need, 32 << 20), 64 << 20))

    y = pl.pallas_call(
        functools.partial(_mlp_kernel, n_layers=n_layers),
        out_shape=jax.ShapeDtypeStruct((n_pad, pf_out), jnp.float32),
        grid_spec=pltpu.PrefetchScalarGridSpec(
            num_scalar_prefetch=0,
            grid=(n_pad // tile,),
            in_specs=[pl.BlockSpec((tile, pf_in), lambda i: (i, 0))]  # x tile
                     + wb_specs
                     + [pl.BlockSpec(memory_space=pltpu.SMEM)],       # alpha
            out_specs=pl.BlockSpec((tile, pf_out), lambda i: (i, 0)),
        ),
        compiler_params=pltpu.CompilerParams(
            dimension_semantics=("parallel",),
            vmem_limit_bytes=vmem_limit),
        cost_estimate=pl.CostEstimate(
            flops=flops, transcendentals=0, bytes_accessed=bytes_accessed),
    )(*flat_args)

    # Strip row / feature padding.
    return y[:N, :f_out]


def init_feedforward_params(key, in_feats, hidden, out_feats, n_layers):
    """Deterministic parameter init matching FeedForwardNet.reset_parameters."""
    gain = jnp.sqrt(2.0)  # nn.init.calculate_gain('relu')
    if n_layers == 1:
        dims = [(in_feats, out_feats)]
    else:
        dims = [(in_feats, hidden)]
        dims += [(hidden, hidden)] * (n_layers - 2)
        dims += [(hidden, out_feats)]

    params = []
    for (fi, fo) in dims:
        key, sub = jax.random.split(key)
        bound = gain * jnp.sqrt(6.0 / (fi + fo))  # xavier_uniform_
        w = jax.random.uniform(sub, (fi, fo), jnp.float32,
                               minval=-bound, maxval=bound)
        b = jnp.zeros((fo,), jnp.float32)
        params.append((w, b))
    alpha = jnp.array([0.25], jnp.float32)  # nn.PReLU default init
    return params, alpha


if __name__ == "__main__":
    key = jax.random.PRNGKey(0)

    # Small but non-trivial shapes: N not a tile multiple, feature dims not
    # multiples of 128 (exercise both padding paths). With tile_n=256 this
    # gives a 2-step parallel grid (feeds both v7x TensorCores).
    N, in_feats, hidden, out_feats, n_layers = 300, 64, 96, 40, 3
    dropout_p = 0.5  # unused at inference (eval mode)

    kx, kp = jax.random.split(key)
    x = jax.random.normal(kx, (N, in_feats), jnp.float32)

    params, alpha = init_feedforward_params(
        kp, in_feats, hidden, out_feats, n_layers)

    y = feedforward_net(x, params, alpha, n_layers, tile_n=256)
    jax.block_until_ready(y)

    # Pure-JAX reference mirroring the kernel's bf16-matmul / f32-epilogue.
    ref = x
    for i, (w, b) in enumerate(params):
        ref = jnp.dot(ref.astype(jnp.bfloat16), w.astype(jnp.bfloat16),
                      preferred_element_type=jnp.float32) + b
        if i < n_layers - 1:
            ref = jnp.where(ref > 0, ref, alpha[0] * ref)

    assert y.shape == (N, out_feats)
    assert jnp.allclose(y, ref, atol=5e-3, rtol=5e-3)

    print("KERNEL_OK")
</pallas_src>

<mosaic_0001>
module attributes {stable_mosaic.version = 11 : i64} {
  func.func @_mlp_kernel(%arg0: i32, %arg1: memref<256x128xbf16, #tpu.memory_space<vmem>>, %arg2: memref<128x128xbf16, #tpu.memory_space<vmem>>, %arg3: memref<1x128xf32, #tpu.memory_space<vmem>>, %arg4: memref<128x128xbf16, #tpu.memory_space<vmem>>, %arg5: memref<1x128xf32, #tpu.memory_space<vmem>>, %arg6: memref<128x128xbf16, #tpu.memory_space<vmem>>, %arg7: memref<1x128xf32, #tpu.memory_space<vmem>>, %arg8: memref<1xf32, #tpu.memory_space<smem>>, %arg9: memref<256x128xf32, #tpu.memory_space<vmem>>) attributes {dimension_semantics = [#tpu.dimension_semantics<parallel>], iteration_bounds = array<i64: 2>, scalar_prefetch = 0 : i64, scratch_operands = 0 : i64, tpu.core_type = #tpu.core_type<tc>, window_params = [{transform_indices = @transform_0, window_bounds = array<i64: 256, 128>}, {pipeline_mode = #tpu.pipeline_mode<synchronous>, transform_indices = @transform_1, window_bounds = array<i64: 128, 128>}, {pipeline_mode = #tpu.pipeline_mode<synchronous>, transform_indices = @transform_2, window_bounds = array<i64: 1, 128>}, {pipeline_mode = #tpu.pipeline_mode<synchronous>, transform_indices = @transform_3, window_bounds = array<i64: 128, 128>}, {pipeline_mode = #tpu.pipeline_mode<synchronous>, transform_indices = @transform_4, window_bounds = array<i64: 1, 128>}, {pipeline_mode = #tpu.pipeline_mode<synchronous>, transform_indices = @transform_5, window_bounds = array<i64: 128, 128>}, {pipeline_mode = #tpu.pipeline_mode<synchronous>, transform_indices = @transform_6, window_bounds = array<i64: 1, 128>}, {transform_indices = @transform_7, window_bounds = array<i64: 1>}, {transform_indices = @transform_8, window_bounds = array<i64: 256, 128>}]} {
    %c0 = arith.constant 0 : index
    %c0_0 = arith.constant 0 : index
    %0 = vector.load %arg1[%c0, %c0_0] : memref<256x128xbf16, #tpu.memory_space<vmem>>, vector<256x128xbf16>
    %c0_1 = arith.constant 0 : index
    %c0_2 = arith.constant 0 : index
    %1 = vector.load %arg2[%c0_1, %c0_2] : memref<128x128xbf16, #tpu.memory_space<vmem>>, vector<128x128xbf16>
    %cst = arith.constant dense<0.000000e+00> : vector<256x128xf32>
    %2 = tpu.matmul %0, %1, %cst {dimension_numbers = #tpu.dot_dimension_numbers<[1], [0], [0], [1], [0, 0, 1, 1], [], []>} : vector<256x128xbf16>, vector<128x128xbf16>, vector<256x128xf32> -> vector<256x128xf32>
    %c0_3 = arith.constant 0 : index
    %c0_4 = arith.constant 0 : index
    %3 = vector.load %arg3[%c0_3, %c0_4] : memref<1x128xf32, #tpu.memory_space<vmem>>, vector<1x128xf32>
    %4 = vector.broadcast %3 : vector<1x128xf32> to vector<256x128xf32>
    %5 = arith.addf %2, %4 : vector<256x128xf32>
    %c0_5 = arith.constant 0 : index
    %6 = memref.load %arg8[%c0_5] : memref<1xf32, #tpu.memory_space<smem>>
    %cst_6 = arith.constant 0.000000e+00 : f32
    %7 = vector.broadcast %cst_6 : f32 to vector<256x128xf32>
    %8 = arith.cmpf ogt, %5, %7 : vector<256x128xf32>
    %9 = vector.broadcast %6 : f32 to vector<256x128xf32>
    %10 = arith.mulf %9, %5 : vector<256x128xf32>
    %11 = arith.select %8, %5, %10 : vector<256x128xi1>, vector<256x128xf32>
    %12 = arith.truncf %11 : vector<256x128xf32> to vector<256x128xbf16>
    %c0_7 = arith.constant 0 : index
    %c0_8 = arith.constant 0 : index
    %13 = vector.load %arg4[%c0_7, %c0_8] : memref<128x128xbf16, #tpu.memory_space<vmem>>, vector<128x128xbf16>
    %cst_9 = arith.constant dense<0.000000e+00> : vector<256x128xf32>
    %14 = tpu.matmul %12, %13, %cst_9 {dimension_numbers = #tpu.dot_dimension_numbers<[1], [0], [0], [1], [0, 0, 1, 1], [], []>} : vector<256x128xbf16>, vector<128x128xbf16>, vector<256x128xf32> -> vector<256x128xf32>
    %c0_10 = arith.constant 0 : index
    %c0_11 = arith.constant 0 : index
    %15 = vector.load %arg5[%c0_10, %c0_11] : memref<1x128xf32, #tpu.memory_space<vmem>>, vector<1x128xf32>
    %16 = vector.broadcast %15 : vector<1x128xf32> to vector<256x128xf32>
    %17 = arith.addf %14, %16 : vector<256x128xf32>
    %c0_12 = arith.constant 0 : index
    %18 = memref.load %arg8[%c0_12] : memref<1xf32, #tpu.memory_space<smem>>
    %cst_13 = arith.constant 0.000000e+00 : f32
    %19 = vector.broadcast %cst_13 : f32 to vector<256x128xf32>
    %20 = arith.cmpf ogt, %17, %19 : vector<256x128xf32>
    %21 = vector.broadcast %18 : f32 to vector<256x128xf32>
    %22 = arith.mulf %21, %17 : vector<256x128xf32>
    %23 = arith.select %20, %17, %22 : vector<256x128xi1>, vector<256x128xf32>
    %24 = arith.truncf %23 : vector<256x128xf32> to vector<256x128xbf16>
    %c0_14 = arith.constant 0 : index
    %c0_15 = arith.constant 0 : index
    %25 = vector.load %arg6[%c0_14, %c0_15] : memref<128x128xbf16, #tpu.memory_space<vmem>>, vector<128x128xbf16>
    %cst_16 = arith.constant dense<0.000000e+00> : vector<256x128xf32>
    %26 = tpu.matmul %24, %25, %cst_16 {dimension_numbers = #tpu.dot_dimension_numbers<[1], [0], [0], [1], [0, 0, 1, 1], [], []>} : vector<256x128xbf16>, vector<128x128xbf16>, vector<256x128xf32> -> vector<256x128xf32>
    %c0_17 = arith.constant 0 : index
    %c0_18 = arith.constant 0 : index
    %27 = vector.load %arg7[%c0_17, %c0_18] : memref<1x128xf32, #tpu.memory_space<vmem>>, vector<1x128xf32>
    %28 = vector.broadcast %27 : vector<1x128xf32> to vector<256x128xf32>
    %29 = arith.addf %26, %28 : vector<256x128xf32>
    %c0_19 = arith.constant 0 : index
    %c0_20 = arith.constant 0 : index
    %30 = vector.load %arg9[%c0_19, %c0_20] : memref<256x128xf32, #tpu.memory_space<vmem>>, vector<256x128xf32>
    tpu.vector_store %arg9[%c0_19, %c0_20], %29 {strides = array<i32>} : memref<256x128xf32, #tpu.memory_space<vmem>>, vector<256x128xf32>,
    return
  }
  func.func @transform_0(%arg0: i32) -> (i32, i32) {
    %c0_i32 = arith.constant 0 : i32
    %c0_i32_0 = arith.constant 0 : i32
    return %arg0, %c0_i32 : i32, i32
  }
  func.func @transform_1(%arg0: i32) -> (i32, i32) {
    %c0_i32 = arith.constant 0 : i32
    %c0_i32_0 = arith.constant 0 : i32
    %c0_i32_1 = arith.constant 0 : i32
    return %c0_i32, %c0_i32_0 : i32, i32
  }
  func.func @transform_2(%arg0: i32) -> (i32, i32) {
    %c0_i32 = arith.constant 0 : i32
    %c0_i32_0 = arith.constant 0 : i32
    %c0_i32_1 = arith.constant 0 : i32
    return %c0_i32, %c0_i32_0 : i32, i32
  }
  func.func @transform_3(%arg0: i32) -> (i32, i32) {
    %c0_i32 = arith.constant 0 : i32
    %c0_i32_0 = arith.constant 0 : i32
    %c0_i32_1 = arith.constant 0 : i32
    return %c0_i32, %c0_i32_0 : i32, i32
  }
  func.func @transform_4(%arg0: i32) -> (i32, i32) {
    %c0_i32 = arith.constant 0 : i32
    %c0_i32_0 = arith.constant 0 : i32
    %c0_i32_1 = arith.constant 0 : i32
    return %c0_i32, %c0_i32_0 : i32, i32
  }
  func.func @transform_5(%arg0: i32) -> (i32, i32) {
    %c0_i32 = arith.constant 0 : i32
    %c0_i32_0 = arith.constant 0 : i32
    %c0_i32_1 = arith.constant 0 : i32
    return %c0_i32, %c0_i32_0 : i32, i32
  }
  func.func @transform_6(%arg0: i32) -> (i32, i32) {
    %c0_i32 = arith.constant 0 : i32
    %c0_i32_0 = arith.constant 0 : i32
    %c0_i32_1 = arith.constant 0 : i32
    return %c0_i32, %c0_i32_0 : i32, i32
  }
  func.func @transform_7(%arg0: i32) -> i32 {
    %c0_i32 = arith.constant 0 : i32
    %c0_i32_0 = arith.constant 0 : i32
    return %c0_i32 : i32
  }
  func.func @transform_8(%arg0: i32) -> (i32, i32) {
    %c0_i32 = arith.constant 0 : i32
    %c0_i32_0 = arith.constant 0 : i32
    return %arg0, %c0_i32 : i32, i32
  }
}

</mosaic_0001>

<bundles_post_ra>
// kernel: tpu_custom_call.1
= control target key start
LH: loop header
LB: loop body
LE: loop exit
PB: predicated region body
PF: predicated region fallthrough
CT: control target
= control target key end

     0   :  { %s2336_s0 = inlined_call_operand.hbm [shape: bf16[512,128], index: 0, kind: input, shape index: {}]   ;;  %s2337_s1 = inlined_call_operand.hbm [shape: bf16[128,128], index: 1, kind: input, shape index: {}]   ;;  %s2338_s2 = inlined_call_operand.vmem [shape: f32[1,128], index: 2, kind: input, shape index: {}]   ;;  %s2339_s3 = inlined_call_operand.hbm [shape: bf16[128,128], index: 3, kind: input, shape index: {}]   ;;  %s2340_s4 = inlined_call_operand.vmem [shape: f32[1,128], index: 4, kind: input, shape index: {}]   ;;  %s2341_s5 = inlined_call_operand.hbm [shape: bf16[128,128], index: 5, kind: input, shape index: {}]   ;;  %s2342_s6 = inlined_call_operand.vmem [shape: f32[1,128], index: 6, kind: input, shape index: {}]   ;;  %s2343_s7 = inlined_call_operand.<no memory space> [shape: f32[1], index: 7, kind: input, shape index: {}]   ;;  %s2344_s8 = inlined_call_operand.hbm [shape: f32[512,128], index: 8, kind: output, shape index: {}]  }
   0x1   :  { %2347 = sst [smem:[#allocation16_spill]] %s2337_s1 }
   0x2   :  { %13 = sst [smem:[#allocation2]] %s2343_s7 }
   0x3   :  { %14 = vsyncpa [#allocation4], 0 }
   0x4   :  { %16 = vsyncpa [#allocation4 + $0x1], 0 }
   0x5   :  { %17 = vsyncpa [#allocation7], 0 }
   0x6   :  { %18 = vsyncpa [#allocation10], 0 }
   0x7   :  { %19 = vsyncpa [#allocation5], 0 }
   0x8   :  { %21 = vsyncpa [#allocation5 + $0x1], 0  ;;  %s1935_s29 = smov 0   ;;  %s1937_s30 = smov 0  }
   0x9   :  { %s1939_s9 = smov 0   ;;  %s1941_s10 = smov 0  }
   0xa LB: > { %s1956_s7 = sadd.s32 4294967295, %s1878_s10   ;;  %s1354_s11 = sadd.s32 4294967294, %s1878_s10   ;;  %s1878_s10 = sphi %s1941_s10, %s2361_s10   ;;  %s1874_s9 = sphi %s1939_s9, %s2360_s9   ;;  %s1870_s30 = sphi %s1937_s30, %s2359_s30   ;;  %s1866_s29 = sphi %s1935_s29, %s2358_s29  }
   0xb   : > { %p47_p0 = scmp.ne.s32.totalorder %s1870_s30, %s1866_s29  ;;  %p48_p1 = scmp.eq.s32.totalorder %s1956_s7, 0 }
   0xc   : > { %p218_p2 = scmp.eq.s32.totalorder %s1956_s7, 1  ;;  %p224_p3 = scmp.eq.s32.totalorder %s1354_s11, 1 }
   0xd   : > { %p1965_p4 = por %p48_p1, %p47_p0  ;;  %p1355_p5 = scmp.ge.s32.totalorder %s1878_s10, 1 }
   0xe   : > { %p1970_p6 = por %p224_p3, %p47_p0  ;;  %p231_p7 = scmp.lt.s32.totalorder %s1878_s10, 3 }
   0xf   : > { %s2350_s1 = sld [smem:[#allocation16_spill]]  ;;  %s1880_s18 = smov [#allocation6]  }
  0x10   : > { %p1978_p8 = pnand %p1355_p5, %p231_p7  ;;  %s244_s19 = sshll.u32 %s1880_s18, 4  ;;  %s245_s19 = int_to_ptr.vmem [resolvable:$true] %s244_s19 }
  0x11   : > { %s259_s23 = sshll.u32 %s2339_s3, 4  ;;  %s2345_s24 = smov 64   ;;  %s260_s23 = int_to_ptr.hbm [resolvable:$true] %s259_s23 }
  0x12   : > { %p1616_p9 = pneg %p1978_p8  ;;  %s2346_s25 = smov 4  }
  0x13   : > { %s1883_s26 = smov [#allocation8]   ;;  %s276_s14 = sshll.u32 %s2341_s5, 4  ;;  %s277_s14 = int_to_ptr.hbm [resolvable:$true] %s276_s14 }
  0x14   : > { %p1986_p10 = pnand %p1616_p9, %p48_p1  ;;  %s261_s27 = sshll.u32 %s1883_s26, 4  ;;  %s262_s27 = int_to_ptr.vmem [resolvable:$true] %s261_s27 }
  0x15   : > { %s242_s16 = sshll.u32 %s2350_s1, 4  ;;  %s1884_s15 = smov [#allocation9]   ;;  %s243_s16 = int_to_ptr.hbm [resolvable:$true] %s242_s16 }
  0x16   : > { %1619 = dma.hbm_to_vmem [thread:$0]  (!%p1986_p10), %s243_s16, 1024, %s245_s19, [#allocation7], %s2345_s24, %s2345_s24, %s2346_s25  }
  0x17   : > { %1622 = dma.hbm_to_vmem [thread:$0]  (!%p1986_p10), %s260_s23, 1024, %s262_s27, [#allocation7], %s2345_s24, %s2345_s24, %s2346_s25  }
  0x18   : > { %s278_s16 = sshll.u32 %s1884_s15, 4  ;;  %s2008_s18 = sadd.s32 1, %s1878_s10   ;;  %s279_s16 = int_to_ptr.vmem [resolvable:$true] %s278_s16 }
  0x19   : > { %1625 = dma.hbm_to_vmem [thread:$0]  (!%p1986_p10), %s277_s14, 1024, %s279_s16, [#allocation10], %s2345_s24, %s2345_s24, %s2346_s25  }
  0x1a   : > { %s31_s19 = ssub.s32 %s1878_s10, %s2008_s18  ;;  %s34_s21 = sadd.s32 1, %s1874_s9 }
  0x1b   : > { %p32_p12 = scmp.eq.s32.totalorder %s31_s19, 0  ;;  %p41_p13 = scmp.ne.s32.totalorder %s1874_s9, %s1870_s30 }
  0x1c   : > { %p42_p0 = scmp.eq.s32.totalorder %s1878_s10, 0  ;;  %p1637_p5 = scmp.lt.s32.totalorder %s1878_s10, 2 }
  0x1d   : > { %s2022_s22 = scalar_select %p32_p12, %s1874_s9, %s34_s21  }
  0x1e   : > { %p2026_p3 = por %p218_p2, %p41_p13  ;;  %s298_s26 = sand.u32 1, %s1874_s9  }
  0x1f   : > { %s1534_s20 = sshll.u32 %s1878_s10, 7  ;;  %p43_p7 = por %p42_p0, %p41_p13 }
  0x20   : > { %s1360_s27 = sshll.u32 %s298_s26, 7  ;;  %s307_s14 = scalar_lea.hbm %s2336_s0, %s1534_s20 }
  0x21   : > { %s308_s15 = sshll.u32 %s307_s14, 4  ;;  %s302_s16 = scalar_lea.vmem [#allocation3], %s1360_s27  ;;  %s309_s15 = int_to_ptr.hbm [resolvable:$true] %s308_s15 }
  0x22   : > { %s310_s19 = sshll.u32 %s302_s16, 4  ;;  %p2036_p9 = pnand %p1637_p5, %p43_p7  ;;  %s311_s19 = int_to_ptr.vmem [resolvable:$true] %s310_s19 }
  0x23   : > { %s299_s24 = scalar_lea.sflag [#allocation4], %s298_s26  ;;  %s1774_s25 = sshra.s32 %s309_s15, 4  ;;  %s1775_s25 = int_to_ptr.hbm [resolvable:$true] %s1774_s25 }
  0x24   : > { %s1776_s1 = scalar_lea.hbm %s1775_s25, 128  ;;  %p1778_p10 = pneg %p2036_p9 }
  0x25   : > { %p1777_p2 = scmp.ne.s32.totalorder %s1775_s25, %s1776_s1  ;;  %s1781_s27 = scalar_lea.hbm %s2336_s0, 256 }
  0x26   : > { %p1782_p0 = scmp.lt.s32.totalorder %s1775_s25, %s2336_s0  ;;  %p1783_p5 = scmp.lt.s32.totalorder %s1781_s27, %s1776_s1 }
  0x27   : > { %p1779_p12 = pnand %p1778_p10, %p1777_p2 }
  0x28   : > { %p1784_p7 = por %p1783_p5, %p1782_p0 }
  0x29   : > { %p1780_p13 = pneg %p1779_p12 }
  0x2b   : > { %p1785_p11 = pnand %p1784_p7, %p1780_p13 }
  0x2d   : > { %1788 = shalt.err (!%p1785_p11)
}
  0x2e   : > { %s2355_s26 = smov 4   ;;  %s2356_s16 = smov 64  }
  0x2f   : > { %1629 = dma.hbm_to_vmem [thread:$0]  (!%p2036_p9), %s309_s15, 2048, %s311_s19, %s299_s24, %s2356_s16, %s2356_s16, %s2355_s26  }
  0x30   : > { %322 = sbr.rel (%p1978_p8) target bundleno = 694 (0x2b6), region = 52  ;;  %s2056_s20 = sand.u32 (!%p1978_p8), 1, %s1870_s30  }
  0x31   : > { %s1364_s25 = sshll.u32 (!%p1978_p8), %s2056_s20, 7  ;;  %s325_s1 = scalar_lea.sflag (!%p1978_p8), [#allocation4], %s2056_s20 }
  0x32   : > { %s2060_s28 = scalar_lea.vmem (!%p1978_p8), [#allocation3], %s1364_s25 }
  0x35   : > { %1849 = dma.done.wait (%p1965_p4), %s325_s1, 2048  }
  0x36   : > { %1851 = vsyncadd (%p1965_p4), %s325_s1, 4294965248 }
  0x37   : > { %1853 = dma.done.wait (%p48_p1), [#allocation7], 2048  }
  0x38   : > { %1855 = vsyncadd (%p48_p1), [#allocation7], 4294965248 }
  0x39   : > { %1857 = dma.done.wait (%p48_p1), [#allocation10], 1024  }
  0x3a   : > { %1859 = vsyncadd (%p48_p1), [#allocation10], 4294966272  ;;  %v1558_v0 = vld [vmem:[#allocation6 + $0x38] sm:$0xff]  ;;  %v1557_v1 = vld [vmem:[#allocation6 + $0x30] sm:$0xff]  ;;  %s664_s12 = sld [smem:[#allocation2]]  ;;  %s1368_s21 = sshll.u32 %s2056_s20, 8 }
  0x3b   : > { %575 = vmatpush.bf16.msra.mxu0 %v1558_v0  ;;  %1576 = vmatpush.bf16.msra.mxu3 %v1558_v0  ;;  %v1556_v2 = vld [vmem:[#allocation6 + $0x28] sm:$0xff]  ;;  %v1555_v3 = vld [vmem:[#allocation6 + $0x20] sm:$0xff]  ;;  %v1554_v4 = vld [vmem:[#allocation6 + $0x18] sm:$0xff]  ;;  %s2226_s14 = scalar_lea.vmem [#allocation11], %s1368_s21  ;;  %s1575_s26 = sshll.u32 %s1956_s7, 8 }
  0x3c   : > { %v1553_v5 = vld [vmem:[#allocation6 + $0x10] sm:$0xff]  ;;  %v1552_v6 = vld [vmem:[#allocation6 + $0x8] sm:$0xff]  ;;  %v1551_v7 = vld [vmem:[#allocation6] sm:$0xff]  ;;  %s1248_s1 = scalar_lea.hbm %s2344_s8, %s1575_s26  ;;  %s1237_s17 = scalar_lea.sflag [#allocation5], %s2056_s20 }
  0x3d   : > { %v1535_v8 = vld [vmem:[%s2060_s28] sm:$0xff]  ;;  %v1536_v9 = vld [vmem:[%s2060_s28 + $0x8] sm:$0xff]  ;;  %v1537_v10 = vld [vmem:[%s2060_s28 + $0x10] sm:$0xff]  ;;  %s1824_s21 = scalar_lea.hbm %s2344_s8, 512 }
  0x3e   : > { %v1538_v11 = vld [vmem:[%s2060_s28 + $0x18] sm:$0xff]  ;;  %v1547_v12 = vld [vmem:[%s2060_s28 + $0x60] sm:$0xff]  ;;  %v1548_v14 = vld [vmem:[%s2060_s28 + $0x68] sm:$0xff] }
  0x3f   : > { %576 = vmatpush.bf16.msra.mxu0 %v1557_v1  ;;  %1577 = vmatpush.bf16.msra.mxu3 %v1557_v1  ;;  %v1539_v13 = vld [vmem:[%s2060_s28 + $0x20] sm:$0xff]  ;;  %v1566_v15 = vld [vmem:[#allocation8 + $0x38] sm:$0xff]  ;;  %v1540_v16 = vld [vmem:[%s2060_s28 + $0x28] sm:$0xff] }
  0x40   : > { %846 = vmatpush.bf16.msra.mxu1 %v1566_v15  ;;  %v1565_v17 = vld [vmem:[#allocation8 + $0x30] sm:$0xff]  ;;  %v1564_v19 = vld [vmem:[#allocation8 + $0x28] sm:$0xff]  ;;  %v1563_v20 = vld [vmem:[#allocation8 + $0x20] sm:$0xff]  ;;  %v2093_v32 = vstv %s664_s12  ;;  %s1251_s12 = sshll.u32 %s1248_s1, 4  ;;  %s1252_s12 = int_to_ptr.hbm [resolvable:$true] %s1251_s12 }
  0x41   : > { %v1549_v18 = vld [vmem:[%s2060_s28 + $0x70] sm:$0xff]  ;;  %v1562_v22 = vld [vmem:[#allocation8 + $0x18] sm:$0xff]  ;;  %v1560_v24 = vld [vmem:[#allocation8 + $0x8] sm:$0xff]  ;;  %s1818_s24 = sshra.s32 %s1252_s12, 4  ;;  %s1819_s24 = int_to_ptr.hbm [resolvable:$true] %s1818_s24 }
  0x42   : > { %v1541_v21 = vld [vmem:[%s2060_s28 + $0x30] sm:$0xff]  ;;  %v1550_v25 = vld [vmem:[%s2060_s28 + $0x78] sm:$0xff]  ;;  %v1559_v26 = vld [vmem:[#allocation8] sm:$0xff]  ;;  %s1820_s7 = scalar_lea.hbm %s1819_s24, 256  ;;  %p1825_p11 = scmp.lt.s32.totalorder %s1819_s24, %s2344_s8 }
  0x43   : > { %577 = vmatpush.bf16.msra.mxu0 %v1556_v2  ;;  %1578 = vmatpush.bf16.msra.mxu3 %v1556_v2  ;;  %v1561_v23 = vld [vmem:[#allocation8 + $0x10] sm:$0xff]  ;;  %v1542_v27 = vld [vmem:[%s2060_s28 + $0x38] sm:$0xff]  ;;  %v1543_v28 = vld [vmem:[%s2060_s28 + $0x40] sm:$0xff]  ;;  %p1821_p1 = scmp.ne.s32.totalorder %s1819_s24, %s1820_s7  ;;  %p1826_p9 = scmp.lt.s32.totalorder %s1824_s21, %s1820_s7 }
  0x44   : > { %847 = vmatpush.bf16.msra.mxu1 %v1565_v17  ;;  %v2090_v30 = vld [vmem:[%s2338_s2] ss:$0 sm:$0xff]  ;;  %v1544_v40 = vld [vmem:[%s2060_s28 + $0x48] sm:$0xff]  ;;  %v1545_v50 = vld [vmem:[%s2060_s28 + $0x50] sm:$0xff] }
  0x45   : > { %v1546_v60 = vld [vmem:[%s2060_s28 + $0x58] sm:$0xff]  ;;  %s1249_s28 = sshll.u32 %s2226_s14, 4  ;;  %p1822_p4 = pnand %p1821_p1, %p2026_p3  ;;  %s1250_s28 = int_to_ptr.vmem [resolvable:$true] %s1249_s28 }
  0x46   : > { %p1827_p2 = por %p1826_p9, %p1825_p11 }
  0x47   : > { %578 = vmatpush.bf16.msra.mxu0 %v1555_v3  ;;  %1579 = vmatpush.bf16.msra.mxu3 %v1555_v3  ;;  %p1823_p8 = pneg %p1822_p4 }
  0x48   : > { %848 = vmatpush.bf16.msra.mxu1 %v1564_v19 }
  0x49   : > { %p1828_p10 = pnand %p1827_p2, %p1823_p8 }
  0x4b   : > { %579 = vmatpush.bf16.msra.mxu0 %v1554_v4  ;;  %1580 = vmatpush.bf16.msra.mxu3 %v1554_v4 }
  0x4c   : > { %849 = vmatpush.bf16.msra.mxu1 %v1563_v20 }
  0x4f   : > { %580 = vmatpush.bf16.msra.mxu0 %v1553_v5  ;;  %1581 = vmatpush.bf16.msra.mxu3 %v1553_v5 }
  0x50   : > { %850 = vmatpush.bf16.msra.mxu1 %v1562_v22 }
  0x53   : > { %581 = vmatpush.bf16.msra.mxu0 %v1552_v6  ;;  %1582 = vmatpush.bf16.msra.mxu3 %v1552_v6 }
  0x54   : > { %851 = vmatpush.bf16.msra.mxu1 %v1561_v23 }
  0x57   : > { %582 = vmatpush.bf16.msra.mxu0 %v1551_v7  ;;  %1583 = vmatpush.bf16.msra.mxu3 %v1551_v7 }
  0x58   : > { %852 = vmatpush.bf16.msra.mxu1 %v1560_v24 }
  0x5a   : > { %583 = vmatmul.bf16.vlgmr.msra.gmra.mxu0 %v1535_v8  ;;  %643 = vmatmul.bf16.vlgmr.msra.gmra.mxu3 %v1547_v12 }
  0x5b   : > { %1584 = vmatpush.bf16.msrb.mxu3 %v1566_v15 }
  0x5c   : > { %853 = vmatpush.bf16.msra.mxu1 %v1559_v26 }
  0x5f   : > { %1585 = vmatpush.bf16.msrb.mxu3 %v1565_v17 }
  0x63   : > { %1586 = vmatpush.bf16.msrb.mxu3 %v1564_v19 }
  0x67   : > { %1587 = vmatpush.bf16.msrb.mxu3 %v1563_v20 }
  0x6a   : > { %588 = vmatmul.bf16.gmra.mxu0 %v1536_v9  ;;  %648 = vmatmul.bf16.gmra.mxu3 %v1548_v14 }
  0x6b   : > { %1588 = vmatpush.bf16.msrb.mxu3 %v1562_v22 }
  0x6f   : > { %1589 = vmatpush.bf16.msrb.mxu3 %v1561_v23 }
  0x73   : > { %1590 = vmatpush.bf16.msrb.mxu3 %v1560_v24 }
  0x77   : > { %1591 = vmatpush.bf16.msrb.mxu3 %v1559_v26 }
  0x7a   : > { %593 = vmatmul.bf16.gmra.mxu0 %v1537_v10  ;;  %653 = vmatmul.bf16.gmra.mxu3 %v1549_v18 }
  0x8a   : > { %598 = vmatmul.bf16.gmra.mxu0 %v1538_v11  ;;  %658 = vmatmul.bf16.gmra.mxu3 %v1550_v25 }
  0x9a   : > { %603 = vmatmul.bf16.gmra.mxu0 %v1539_v13 }
  0xaa   : > { %608 = vmatmul.bf16.gmra.mxu0 %v1540_v16 }
  0xba   : > { %613 = vmatmul.bf16.gmra.mxu0 %v1541_v21 }
  0xca   : > { %618 = vmatmul.bf16.gmra.mxu0 %v1542_v27 }
  0xd7   : > { %v584_v29 = vpop.f32.mrf.mxu0 }
  0xd8   : > { %v585_v31 = vadd.f32 %v2090_v30, %v584_v29 }
  0xda   : > { %623 = vmatmul.bf16.gmra.mxu0 %v1543_v28  ;;  %v698_v34 = vmul.f32 %v2093_v32, %v585_v31  ;;  %vm665_vm0 = vcmp.gt.f32.partialorder %v585_v31, 0.0 }
  0xdc   : > { %v730_v37 = vsel %vm665_vm0, %v585_v31, %v698_v34 }
  0xdd   : > { %v644_v3 = vpop.f32.mrf.mxu3 }
  0xde   : > { %v645_v8 = vadd.f32 %v2090_v30, %v644_v3 }
  0xdf   : > { %v586_v33 = vpop.f32.mrf.mxu0 }
  0xe0   : > { %v587_v35 = vadd.f32 %v2090_v30, %v586_v33  ;;  %v722_v12 = vmul.f32 %v2093_v32, %v645_v8  ;;  %vm689_vm8 = vcmp.gt.f32.partialorder %v645_v8, 0.0 }
  0xe2   : > { %v699_v36 = vmul.f32 %v2093_v32, %v587_v35  ;;  %vm666_vm1 = vcmp.gt.f32.partialorder %v587_v35, 0.0  ;;  %v754_v19 = vsel %vm689_vm8, %v645_v8, %v722_v12 }
  0xe4   : > { %v731_v38 = vsel %vm666_vm1, %v587_v35, %v699_v36 }
  0xe5   : > { %v762_v39 = vpack.c.bf16 %v731_v38, %v730_v37  ;;  %v646_v9 = vpop.f32.mrf.mxu3 }
  0xe6   : > { %v647_v10 = vadd.f32 %v2090_v30, %v646_v9 }
  0xe7   : > { %v589_v41 = vpop.f32.mrf.mxu0  ;;  %854 = vmatmul.bf16.vlgmr.msra.gmra.mxu1 %v762_v39 }
  0xe8   : > { %v590_v42 = vadd.f32 %v2090_v30, %v589_v41  ;;  %v723_v13 = vmul.f32 %v2093_v32, %v647_v10  ;;  %vm690_vm9 = vcmp.gt.f32.partialorder %v647_v10, 0.0  ;;  %v1574_v41 = vld [vmem:[#allocation9 + $0x38] sm:$0xff] }
  0xe9   : > { %1115 = vmatpush.bf16.msra.mxu2 %v1574_v41  ;;  %1592 = vmatpush.bf16.msra.mxu3 %v1574_v41 }
  0xea   : > { %628 = vmatmul.bf16.gmra.mxu0 %v1544_v40  ;;  %v700_v44 = vmul.f32 %v2093_v32, %v590_v42  ;;  %vm667_vm2 = vcmp.gt.f32.partialorder %v590_v42, 0.0  ;;  %v755_v20 = vsel %vm690_vm9, %v647_v10, %v723_v13  ;;  %v1567_v13 = vld [vmem:[#allocation9] sm:$0xff] }
  0xeb   : > { %v774_v21 = vpack.c.bf16 %v755_v20, %v754_v19 }
  0xec   : > { %v732_v47 = vsel %vm667_vm2, %v590_v42, %v700_v44 }
  0xed   : > { %v649_v18 = vpop.f32.mrf.mxu3  ;;  %914 = vmatmul.bf16.vlgmr.msrb.gmra.mxu3 %v774_v21 }
  0xee   : > { %v650_v26 = vadd.f32 %v2090_v30, %v649_v18 }
  0xef   : > { %v591_v43 = vpop.f32.mrf.mxu0 }
  0xf0   : > { %v592_v45 = vadd.f32 %v2090_v30, %v591_v43  ;;  %v724_v31 = vmul.f32 %v2093_v32, %v650_v26  ;;  %vm691_vm13 = vcmp.gt.f32.partialorder %v650_v26, 0.0 }
  0xf2   : > { %v701_v46 = vmul.f32 %v2093_v32, %v592_v45  ;;  %vm668_vm3 = vcmp.gt.f32.partialorder %v592_v45, 0.0  ;;  %v756_v39 = vsel %vm691_vm13, %v650_v26, %v724_v31 }
  0xf4   : > { %v733_v48 = vsel %vm668_vm3, %v592_v45, %v701_v46 }
  0xf5   : > { %v763_v49 = vpack.c.bf16 %v733_v48, %v732_v47  ;;  %v651_v27 = vpop.f32.mrf.mxu3  ;;  %v1573_v47 = vld [vmem:[#allocation9 + $0x30] sm:$0xff] }
  0xf6   : > { %v652_v28 = vadd.f32 %v2090_v30, %v651_v27  ;;  %1116 = vmatpush.bf16.msra.mxu2 %v1573_v47  ;;  %1593 = vmatpush.bf16.msra.mxu3 %v1573_v47 }
  0xf7   : > { %v594_v51 = vpop.f32.mrf.mxu0  ;;  %859 = vmatmul.bf16.gmra.mxu1 %v763_v49 }
  0xf8   : > { %v595_v52 = vadd.f32 %v2090_v30, %v594_v51  ;;  %v725_v33 = vmul.f32 %v2093_v32, %v652_v28  ;;  %vm692_vm14 = vcmp.gt.f32.partialorder %v652_v28, 0.0 }
  0xfa   : > { %633 = vmatmul.bf16.gmra.mxu0 %v1545_v50  ;;  %v702_v54 = vmul.f32 %v2093_v32, %v595_v52  ;;  %vm669_vm4 = vcmp.gt.f32.partialorder %v595_v52, 0.0  ;;  %v757_v40 = vsel %vm692_vm14, %v652_v28, %v725_v33  ;;  %v1572_v50 = vld [vmem:[#allocation9 + $0x28] sm:$0xff] }
  0xfb   : > { %v775_v42 = vpack.c.bf16 %v757_v40, %v756_v39  ;;  %1117 = vmatpush.bf16.msra.mxu2 %v1572_v50  ;;  %1594 = vmatpush.bf16.msra.mxu3 %v1572_v50 }
  0xfc   : > { %v734_v57 = vsel %vm669_vm4, %v595_v52, %v702_v54 }
  0xfd   : > { %v654_v38 = vpop.f32.mrf.mxu3  ;;  %919 = vmatmul.bf16.gmra.mxu3 %v775_v42 }
  0xfe   : > { %v655_v48 = vadd.f32 %v2090_v30, %v654_v38 }
  0xff   : > { %v596_v53 = vpop.f32.mrf.mxu0 }
 0x100   : > { %v597_v55 = vadd.f32 %v2090_v30, %v596_v53  ;;  %v726_v53 = vmul.f32 %v2093_v32, %v655_v48  ;;  %vm693_vm1 = vcmp.gt.f32.partialorder %v655_v48, 0.0 }
 0x102   : > { %v703_v56 = vmul.f32 %v2093_v32, %v597_v55  ;;  %vm670_vm5 = vcmp.gt.f32.partialorder %v597_v55, 0.0 }
 0x104   : > { %v735_v58 = vsel %vm670_vm5, %v597_v55, %v703_v56  ;;  %v1571_v56 = vld [vmem:[#allocation9 + $0x20] sm:$0xff] }
 0x105   : > { %v764_v59 = vpack.c.bf16 %v735_v58, %v734_v57  ;;  %v656_v49 = vpop.f32.mrf.mxu3  ;;  %1118 = vmatpush.bf16.msra.mxu2 %v1571_v56  ;;  %1595 = vmatpush.bf16.msra.mxu3 %v1571_v56 }
 0x106   : > { %v657_v51 = vadd.f32 %v2090_v30, %v656_v49 }
 0x107   : > { %v599_v61 = vpop.f32.mrf.mxu0  ;;  %864 = vmatmul.bf16.gmra.mxu1 %v764_v59 }
 0x108   : > { %v600_v62 = vadd.f32 %v2090_v30, %v599_v61  ;;  %v727_v54 = vmul.f32 %v2093_v32, %v657_v51  ;;  %vm694_vm2 = vcmp.gt.f32.partialorder %v657_v51, 0.0 }
 0x10a   : > { %638 = vmatmul.bf16.gmra.mxu0 %v1546_v60  ;;  %v704_v0 = vmul.f32 %v2093_v32, %v600_v62  ;;  %vm671_vm6 = vcmp.gt.f32.partialorder %v600_v62, 0.0  ;;  %v758_v60 = vsel %vm693_vm1, %v655_v48, %v726_v53  ;;  %v759_v61 = vsel %vm694_vm2, %v657_v51, %v727_v54 }
 0x10c   : > { %v736_v4 = vsel %vm671_vm6, %v600_v62, %v704_v0  ;;  %v776_v62 = vpack.c.bf16 %v759_v61, %v758_v60 }
 0x10d   : > { %v659_v3 = vpop.f32.mrf.mxu3 }
 0x10e   : > { %924 = vmatmul.bf16.gmra.mxu3 %v776_v62 }
 0x10f   : > { %v601_v63 = vpop.f32.mrf.mxu0 }
 0x110   : > { %v602_v1 = vadd.f32 %v2090_v30, %v601_v63  ;;  %v1570_v63 = vld [vmem:[#allocation9 + $0x18] sm:$0xff] }
 0x111   : > { %1119 = vmatpush.bf16.msra.mxu2 %v1570_v63  ;;  %1596 = vmatpush.bf16.msra.mxu3 %v1570_v63 }
 0x112   : > { %v705_v2 = vmul.f32 %v2093_v32, %v602_v1  ;;  %vm672_vm7 = vcmp.gt.f32.partialorder %v602_v1, 0.0 }
 0x114   : > { %v737_v5 = vsel %vm672_vm7, %v602_v1, %v705_v2 }
 0x115   : > { %v765_v6 = vpack.c.bf16 %v737_v5, %v736_v4  ;;  %v1569_v5 = vld [vmem:[#allocation9 + $0x10] sm:$0xff]  ;;  %v661_v9 = vpop.f32.mrf.mxu3 }
 0x116   : > { %1120 = vmatpush.bf16.msra.mxu2 %v1569_v5  ;;  %1597 = vmatpush.bf16.msra.mxu3 %v1569_v5 }
 0x117   : > { %v604_v7 = vpop.f32.mrf.mxu0  ;;  %869 = vmatmul.bf16.gmra.mxu1 %v765_v6  ;;  %v660_v6 = vadd.f32 %v2090_v30, %v659_v3 }
 0x118   : > { %v605_v11 = vadd.f32 %v2090_v30, %v604_v7  ;;  %v1568_v7 = vld [vmem:[#allocation9 + $0x8] sm:$0xff] }
 0x119   : > { %v728_v10 = vmul.f32 %v2093_v32, %v660_v6  ;;  %vm695_vm5 = vcmp.gt.f32.partialorder %v660_v6, 0.0 }
 0x11a   : > { %v706_v15 = vmul.f32 %v2093_v32, %v605_v11  ;;  %vm673_vm10 = vcmp.gt.f32.partialorder %v605_v11, 0.0  ;;  %1121 = vmatpush.bf16.msra.mxu2 %v1568_v7  ;;  %1598 = vmatpush.bf16.msra.mxu3 %v1568_v7 }
 0x11b   : > { %v760_v18 = vsel %vm695_vm5, %v660_v6, %v728_v10 }
 0x11c   : > { %v738_v22 = vsel %vm673_vm10, %v605_v11, %v706_v15  ;;  %v662_v11 = vadd.f32 %v2090_v30, %v661_v9 }
 0x11e   : > { %1122 = vmatpush.bf16.msra.mxu2 %v1567_v13  ;;  %vm696_vm6 = vcmp.gt.f32.partialorder %v662_v11, 0.0  ;;  %1599 = vmatpush.bf16.msra.mxu3 %v1567_v13 }
 0x11f   : > { %v606_v14 = vpop.f32.mrf.mxu0 }
 0x120   : > { %v607_v16 = vadd.f32 %v2090_v30, %v606_v14 }
 0x122   : > { %v707_v17 = vmul.f32 %v2093_v32, %v607_v16  ;;  %vm674_vm11 = vcmp.gt.f32.partialorder %v607_v16, 0.0 }
 0x124   : > { %v739_v23 = vsel %vm674_vm11, %v607_v16, %v707_v17  ;;  %v729_v16 = vmul.f32 %v2093_v32, %v662_v11 }
 0x125   : > { %v766_v24 = vpack.c.bf16 %v739_v23, %v738_v22 }
 0x126   : > { %v761_v19 = vsel %vm696_vm6, %v662_v11, %v729_v16 }
 0x127   : > { %v609_v25 = vpop.f32.mrf.mxu0  ;;  %874 = vmatmul.bf16.gmra.mxu1 %v766_v24  ;;  %v777_v20 = vpack.c.bf16 %v761_v19, %v760_v18 }
 0x128   : > { %v610_v29 = vadd.f32 %v2090_v30, %v609_v25 }
 0x129   : > { %929 = vmatmul.bf16.gmra.mxu3 %v777_v20 }
 0x12a   : > { %v708_v35 = vmul.f32 %v2093_v32, %v610_v29  ;;  %vm675_vm12 = vcmp.gt.f32.partialorder %v610_v29, 0.0 }
 0x12c   : > { %v740_v43 = vsel %vm675_vm12, %v610_v29, %v708_v35  ;;  %v2152_v35 = vld [vmem:[%s2340_s4] ss:$0 sm:$0xff] }
 0x12f   : > { %v611_v34 = vpop.f32.mrf.mxu0 }
 0x130   : > { %v612_v36 = vadd.f32 %v2090_v30, %v611_v34 }
 0x132   : > { %v709_v37 = vmul.f32 %v2093_v32, %v612_v36  ;;  %vm676_vm15 = vcmp.gt.f32.partialorder %v612_v36, 0.0 }
 0x134   : > { %v741_v44 = vsel %vm676_vm15, %v612_v36, %v709_v37 }
 0x135   : > { %v767_v45 = vpack.c.bf16 %v741_v44, %v740_v43 }
 0x137   : > { %v614_v46 = vpop.f32.mrf.mxu0  ;;  %879 = vmatmul.bf16.gmra.mxu1 %v767_v45 }
 0x138   : > { %v615_v52 = vadd.f32 %v2090_v30, %v614_v46 }
 0x13a   : > { %v710_v57 = vmul.f32 %v2093_v32, %v615_v52  ;;  %vm677_vm0 = vcmp.gt.f32.partialorder %v615_v52, 0.0 }
 0x13c   : > { %v742_v0 = vsel %vm677_vm0, %v615_v52, %v710_v57 }
 0x13f   : > { %v616_v55 = vpop.f32.mrf.mxu0 }
 0x140   : > { %v617_v58 = vadd.f32 %v2090_v30, %v616_v55 }
 0x142   : > { %v711_v59 = vmul.f32 %v2093_v32, %v617_v58  ;;  %vm678_vm3 = vcmp.gt.f32.partialorder %v617_v58, 0.0 }
 0x144   : > { %v743_v1 = vsel %vm678_vm3, %v617_v58, %v711_v59 }
 0x145   : > { %v768_v2 = vpack.c.bf16 %v743_v1, %v742_v0 }
 0x147   : > { %v619_v4 = vpop.f32.mrf.mxu0  ;;  %884 = vmatmul.bf16.gmra.mxu1 %v768_v2 }
 0x148   : > { %v620_v8 = vadd.f32 %v2090_v30, %v619_v4 }
 0x14a   : > { %v712_v14 = vmul.f32 %v2093_v32, %v620_v8  ;;  %vm679_vm4 = vcmp.gt.f32.partialorder %v620_v8, 0.0 }
 0x14c   : > { %v744_v21 = vsel %vm679_vm4, %v620_v8, %v712_v14 }
 0x14f   : > { %v621_v12 = vpop.f32.mrf.mxu0 }
 0x150   : > { %v622_v15 = vadd.f32 %v2090_v30, %v621_v12 }
 0x152   : > { %v713_v17 = vmul.f32 %v2093_v32, %v622_v15  ;;  %vm680_vm7 = vcmp.gt.f32.partialorder %v622_v15, 0.0 }
 0x154   : > { %v745_v22 = vsel %vm680_vm7, %v622_v15, %v713_v17 }
 0x155   : > { %v769_v23 = vpack.c.bf16 %v745_v22, %v744_v21 }
 0x157   : > { %v624_v24 = vpop.f32.mrf.mxu0  ;;  %889 = vmatmul.bf16.gmra.mxu1 %v769_v23 }
 0x158   : > { %v625_v25 = vadd.f32 %v2090_v30, %v624_v24 }
 0x15a   : > { %v714_v27 = vmul.f32 %v2093_v32, %v625_v25  ;;  %vm681_vm8 = vcmp.gt.f32.partialorder %v625_v25, 0.0 }
 0x15c   : > { %v746_v33 = vsel %vm681_vm8, %v625_v25, %v714_v27 }
 0x15f   : > { %v626_v26 = vpop.f32.mrf.mxu0 }
 0x160   : > { %v627_v28 = vadd.f32 %v2090_v30, %v626_v26 }
 0x162   : > { %v715_v29 = vmul.f32 %v2093_v32, %v627_v28  ;;  %vm682_vm9 = vcmp.gt.f32.partialorder %v627_v28, 0.0 }
 0x164   : > { %v855_v31 = vpop.f32.mrf.mxu1  ;;  %v747_v34 = vsel %vm682_vm9, %v627_v28, %v715_v29 }
 0x165   : > { %v770_v36 = vpack.c.bf16 %v747_v34, %v746_v33  ;;  %v856_v38 = vadd.f32 %v2152_v35, %v855_v31 }
 0x167   : > { %v629_v37 = vpop.f32.mrf.mxu0  ;;  %894 = vmatmul.bf16.gmra.mxu1 %v770_v36  ;;  %v967_v41 = vmul.f32 %v856_v38, %v2093_v32  ;;  %vm935_vm10 = vcmp.gt.f32.partialorder %v856_v38, 0.0 }
 0x168   : > { %v630_v39 = vadd.f32 %v2090_v30, %v629_v37 }
 0x169   : > { %v999_v47 = vsel %vm935_vm10, %v856_v38, %v967_v41 }
 0x16a   : > { %v716_v45 = vmul.f32 %v2093_v32, %v630_v39  ;;  %vm683_vm12 = vcmp.gt.f32.partialorder %v630_v39, 0.0 }
 0x16c   : > { %v857_v40 = vpop.f32.mrf.mxu1  ;;  %v748_v52 = vsel %vm683_vm12, %v630_v39, %v716_v45 }
 0x16d   : > { %v858_v42 = vadd.f32 %v2152_v35, %v857_v40 }
 0x16f   : > { %v968_v43 = vmul.f32 %v858_v42, %v2093_v32  ;;  %v631_v44 = vpop.f32.mrf.mxu0  ;;  %vm936_vm11 = vcmp.gt.f32.partialorder %v858_v42, 0.0 }
 0x170   : > { %v632_v46 = vadd.f32 %v2090_v30, %v631_v44  ;;  %v915_v38 = vpop.f32.mrf.mxu3 }
 0x171   : > { %v1000_v48 = vsel %vm936_vm11, %v858_v42, %v968_v43  ;;  %v916_v40 = vadd.f32 %v2152_v35, %v915_v38 }
 0x172   : > { %v717_v49 = vmul.f32 %v2093_v32, %v632_v46  ;;  %v1031_v50 = vpack.c.bf16 %v1000_v48, %v999_v47  ;;  %vm684_vm13 = vcmp.gt.f32.partialorder %v632_v46, 0.0 }
 0x173   : > { %v991_v45 = vmul.f32 %v916_v40, %v2093_v32  ;;  %vm959_vm10 = vcmp.gt.f32.partialorder %v916_v40, 0.0 }
 0x174   : > { %v860_v51 = vpop.f32.mrf.mxu1  ;;  %1123 = vmatmul.bf16.vlgmr.msra.gmra.mxu2 %v1031_v50  ;;  %v749_v53 = vsel %vm684_vm13, %v632_v46, %v717_v49 }
 0x175   : > { %v771_v54 = vpack.c.bf16 %v749_v53, %v748_v52  ;;  %v861_v56 = vadd.f32 %v2152_v35, %v860_v51  ;;  %v1023_v51 = vsel %vm959_vm10, %v916_v40, %v991_v45 }
 0x177   : > { %v634_v55 = vpop.f32.mrf.mxu0  ;;  %899 = vmatmul.bf16.gmra.mxu1 %v771_v54  ;;  %v969_v59 = vmul.f32 %v861_v56, %v2093_v32  ;;  %vm937_vm14 = vcmp.gt.f32.partialorder %v861_v56, 0.0 }
 0x178   : > { %v635_v57 = vadd.f32 %v2090_v30, %v634_v55  ;;  %v917_v46 = vpop.f32.mrf.mxu3 }
 0x179   : > { %v1001_v1 = vsel %vm937_vm14, %v861_v56, %v969_v59  ;;  %v918_v49 = vadd.f32 %v2152_v35, %v917_v46 }
 0x17a   : > { %v718_v63 = vmul.f32 %v2093_v32, %v635_v57  ;;  %vm685_vm0 = vcmp.gt.f32.partialorder %v635_v57, 0.0 }
 0x17b   : > { %vm960_vm11 = vcmp.gt.f32.partialorder %v918_v49, 0.0  ;;  %v992_v52 = vmul.f32 %v918_v49, %v2093_v32 }
 0x17c   : > { %v862_v58 = vpop.f32.mrf.mxu1  ;;  %v750_v6 = vsel %vm685_vm0, %v635_v57, %v718_v63 }
 0x17d   : > { %v863_v60 = vadd.f32 %v2152_v35, %v862_v58  ;;  %v1024_v54 = vsel %vm960_vm11, %v918_v49, %v992_v52 }
 0x17e   : > { %v1043_v55 = vpack.c.bf16 %v1024_v54, %v1023_v51 }
 0x17f   : > { %v970_v61 = vmul.f32 %v863_v60, %v2093_v32  ;;  %v636_v62 = vpop.f32.mrf.mxu0  ;;  %vm938_vm15 = vcmp.gt.f32.partialorder %v863_v60, 0.0 }
 0x180   : > { %v637_v0 = vadd.f32 %v2090_v30, %v636_v62  ;;  %v920_v56 = vpop.f32.mrf.mxu3  ;;  %1183 = vmatmul.bf16.vlgmr.msra.gmra.mxu3 %v1043_v55 }
 0x181   : > { %v1002_v2 = vsel %vm938_vm15, %v863_v60, %v970_v61  ;;  %v921_v61 = vadd.f32 %v2152_v35, %v920_v56 }
 0x182   : > { %v719_v3 = vmul.f32 %v2093_v32, %v637_v0  ;;  %v1032_v4 = vpack.c.bf16 %v1002_v2, %v1001_v1  ;;  %vm686_vm1 = vcmp.gt.f32.partialorder %v637_v0, 0.0 }
 0x183   : > { %v993_v2 = vmul.f32 %v921_v61, %v2093_v32  ;;  %vm961_vm14 = vcmp.gt.f32.partialorder %v921_v61, 0.0 }
 0x184   : > { %v865_v5 = vpop.f32.mrf.mxu1  ;;  %1128 = vmatmul.bf16.gmra.mxu2 %v1032_v4  ;;  %v751_v7 = vsel %vm686_vm1, %v637_v0, %v719_v3 }
 0x185   : > { %v772_v8 = vpack.c.bf16 %v751_v7, %v750_v6  ;;  %v866_v10 = vadd.f32 %v2152_v35, %v865_v5  ;;  %v1025_v7 = vsel %vm961_vm14, %v921_v61, %v993_v2 }
 0x187   : > { %v639_v9 = vpop.f32.mrf.mxu0  ;;  %904 = vmatmul.bf16.gmra.mxu1 %v772_v8  ;;  %v971_v13 = vmul.f32 %v866_v10, %v2093_v32  ;;  %vm939_vm2 = vcmp.gt.f32.partialorder %v866_v10, 0.0 }
 0x188   : > { %v640_v11 = vadd.f32 %v2090_v30, %v639_v9  ;;  %v922_v63 = vpop.f32.mrf.mxu3 }
 0x189   : > { %v1003_v19 = vsel %vm939_vm2, %v866_v10, %v971_v13  ;;  %v923_v3 = vadd.f32 %v2152_v35, %v922_v63 }
 0x18a   : > { %v720_v17 = vmul.f32 %v2093_v32, %v640_v11  ;;  %vm687_vm4 = vcmp.gt.f32.partialorder %v640_v11, 0.0 }
 0x18b   : > { %v994_v5 = vmul.f32 %v923_v3, %v2093_v32  ;;  %vm962_vm15 = vcmp.gt.f32.partialorder %v923_v3, 0.0 }
 0x18c   : > { %v867_v12 = vpop.f32.mrf.mxu1  ;;  %v752_v24 = vsel %vm687_vm4, %v640_v11, %v720_v17 }
 0x18d   : > { %v868_v14 = vadd.f32 %v2152_v35, %v867_v12  ;;  %v1026_v8 = vsel %vm962_vm15, %v923_v3, %v994_v5 }
 0x18e   : > { %v1044_v9 = vpack.c.bf16 %v1026_v8, %v1025_v7 }
 0x18f   : > { %v972_v15 = vmul.f32 %v868_v14, %v2093_v32  ;;  %v641_v16 = vpop.f32.mrf.mxu0  ;;  %vm940_vm3 = vcmp.gt.f32.partialorder %v868_v14, 0.0 }
 0x190   : > { %v642_v18 = vadd.f32 %v2090_v30, %v641_v16  ;;  %1188 = vmatmul.bf16.gmra.mxu3 %v1044_v9 }
 0x191   : > { %v1004_v20 = vsel %vm940_vm3, %v868_v14, %v972_v15  ;;  %v925_v10 = vpop.f32.mrf.mxu3 }
 0x192   : > { %v721_v21 = vmul.f32 %v2093_v32, %v642_v18  ;;  %v1033_v22 = vpack.c.bf16 %v1004_v20, %v1003_v19  ;;  %vm688_vm5 = vcmp.gt.f32.partialorder %v642_v18, 0.0  ;;  %v926_v15 = vadd.f32 %v2152_v35, %v925_v10 }
 0x194   : > { %v870_v23 = vpop.f32.mrf.mxu1  ;;  %1133 = vmatmul.bf16.gmra.mxu2 %v1033_v22  ;;  %v753_v25 = vsel %vm688_vm5, %v642_v18, %v721_v21  ;;  %v995_v20 = vmul.f32 %v926_v15, %v2093_v32  ;;  %vm963_vm2 = vcmp.gt.f32.partialorder %v926_v15, 0.0 }
 0x195   : > { %v773_v26 = vpack.c.bf16 %v753_v25, %v752_v24  ;;  %v871_v27 = vadd.f32 %v2152_v35, %v870_v23 }
 0x196   : > { %v1027_v25 = vsel %vm963_vm2, %v926_v15, %v995_v20 }
 0x197   : > { %909 = vmatmul.bf16.gmra.mxu1 %v773_v26  ;;  %v973_v29 = vmul.f32 %v871_v27, %v2093_v32  ;;  %vm941_vm6 = vcmp.gt.f32.partialorder %v871_v27, 0.0 }
 0x199   : > { %v1005_v33 = vsel %vm941_vm6, %v871_v27, %v973_v29  ;;  %v927_v17 = vpop.f32.mrf.mxu3 }
 0x19a   : > { %v928_v21 = vadd.f32 %v2152_v35, %v927_v17 }
 0x19c   : > { %v872_v28 = vpop.f32.mrf.mxu1  ;;  %v996_v23 = vmul.f32 %v928_v21, %v2093_v32  ;;  %vm964_vm3 = vcmp.gt.f32.partialorder %v928_v21, 0.0 }
 0x19d   : > { %v873_v30 = vadd.f32 %v2152_v35, %v872_v28 }
 0x19e   : > { %v1028_v26 = vsel %vm964_vm3, %v928_v21, %v996_v23 }
 0x19f   : > { %v974_v31 = vmul.f32 %v873_v30, %v2093_v32  ;;  %vm942_vm7 = vcmp.gt.f32.partialorder %v873_v30, 0.0  ;;  %v1045_v27 = vpack.c.bf16 %v1028_v26, %v1027_v25 }
 0x1a1   : > { %v1006_v34 = vsel %vm942_vm7, %v873_v30, %v974_v31  ;;  %1193 = vmatmul.bf16.gmra.mxu3 %v1045_v27 }
 0x1a2   : > { %v1034_v36 = vpack.c.bf16 %v1006_v34, %v1005_v33 }
 0x1a4   : > { %v875_v37 = vpop.f32.mrf.mxu1  ;;  %1138 = vmatmul.bf16.gmra.mxu2 %v1034_v36 }
 0x1a5   : > { %v876_v39 = vadd.f32 %v2152_v35, %v875_v37 }
 0x1a7   : > { %v975_v42 = vmul.f32 %v876_v39, %v2093_v32  ;;  %vm943_vm8 = vcmp.gt.f32.partialorder %v876_v39, 0.0 }
 0x1a9   : > { %v1007_v47 = vsel %vm943_vm8, %v876_v39, %v975_v42 }
 0x1ac   : > { %v877_v41 = vpop.f32.mrf.mxu1  ;;  %v930_v28 = vpop.f32.mrf.mxu3 }
 0x1ad   : > { %v878_v43 = vadd.f32 %v2152_v35, %v877_v41  ;;  %v931_v34 = vadd.f32 %v2152_v35, %v930_v28 }
 0x1af   : > { %v976_v44 = vmul.f32 %v878_v43, %v2093_v32  ;;  %vm944_vm9 = vcmp.gt.f32.partialorder %v878_v43, 0.0  ;;  %v997_v40 = vmul.f32 %v931_v34, %v2093_v32  ;;  %vm965_vm6 = vcmp.gt.f32.partialorder %v931_v34, 0.0 }
 0x1b1   : > { %v1008_v48 = vsel %vm944_vm9, %v878_v43, %v976_v44  ;;  %v1029_v45 = vsel %vm965_vm6, %v931_v34, %v997_v40 }
 0x1b2   : > { %v1035_v50 = vpack.c.bf16 %v1008_v48, %v1007_v47 }
 0x1b4   : > { %v880_v53 = vpop.f32.mrf.mxu1  ;;  %1143 = vmatmul.bf16.gmra.mxu2 %v1035_v50  ;;  %v932_v37 = vpop.f32.mrf.mxu3 }
 0x1b5   : > { %v881_v57 = vadd.f32 %v2152_v35, %v880_v53  ;;  %v933_v41 = vadd.f32 %v2152_v35, %v932_v37 }
 0x1b7   : > { %v977_v59 = vmul.f32 %v881_v57, %v2093_v32  ;;  %vm945_vm12 = vcmp.gt.f32.partialorder %v881_v57, 0.0  ;;  %v998_v43 = vmul.f32 %v933_v41, %v2093_v32  ;;  %vm966_vm7 = vcmp.gt.f32.partialorder %v933_v41, 0.0 }
 0x1b9   : > { %v1009_v0 = vsel %vm945_vm12, %v881_v57, %v977_v59  ;;  %v1030_v46 = vsel %vm966_vm7, %v933_v41, %v998_v43  ;;  %v2222_v57 = vld [vmem:[%s2342_s6] ss:$0 sm:$0xff] }
 0x1ba   : > { %v1046_v47 = vpack.c.bf16 %v1030_v46, %v1029_v45 }
 0x1bc   : > { %v882_v58 = vpop.f32.mrf.mxu1  ;;  %1198 = vmatmul.bf16.gmra.mxu3 %v1046_v47 }
 0x1bd   : > { %v883_v60 = vadd.f32 %v2152_v35, %v882_v58 }
 0x1bf   : > { %v978_v62 = vmul.f32 %v883_v60, %v2093_v32  ;;  %vm946_vm13 = vcmp.gt.f32.partialorder %v883_v60, 0.0 }
 0x1c1   : > { %v1010_v1 = vsel %vm946_vm13, %v883_v60, %v978_v62 }
 0x1c2   : > { %v1036_v4 = vpack.c.bf16 %v1010_v1, %v1009_v0 }
 0x1c4   : > { %v885_v6 = vpop.f32.mrf.mxu1  ;;  %1148 = vmatmul.bf16.gmra.mxu2 %v1036_v4 }
 0x1c5   : > { %v886_v11 = vadd.f32 %v2152_v35, %v885_v6 }
 0x1c7   : > { %v979_v13 = vmul.f32 %v886_v11, %v2093_v32  ;;  %vm947_vm0 = vcmp.gt.f32.partialorder %v886_v11, 0.0 }
 0x1c9   : > { %v1011_v18 = vsel %vm947_vm0, %v886_v11, %v979_v13 }
 0x1cc   : > { %v887_v12 = vpop.f32.mrf.mxu1 }
 0x1cd   : > { %v888_v14 = vadd.f32 %v2152_v35, %v887_v12 }
 0x1cf   : > { %v980_v16 = vmul.f32 %v888_v14, %v2093_v32  ;;  %vm948_vm1 = vcmp.gt.f32.partialorder %v888_v14, 0.0 }
 0x1d1   : > { %v1012_v19 = vsel %vm948_vm1, %v888_v14, %v980_v16 }
 0x1d2   : > { %v1037_v22 = vpack.c.bf16 %v1012_v19, %v1011_v18 }
 0x1d4   : > { %v890_v24 = vpop.f32.mrf.mxu1  ;;  %1153 = vmatmul.bf16.gmra.mxu2 %v1037_v22 }
 0x1d5   : > { %v891_v29 = vadd.f32 %v2152_v35, %v890_v24 }
 0x1d7   : > { %v981_v31 = vmul.f32 %v891_v29, %v2093_v32  ;;  %vm949_vm4 = vcmp.gt.f32.partialorder %v891_v29, 0.0 }
 0x1d9   : > { %v1013_v38 = vsel %vm949_vm4, %v891_v29, %v981_v31 }
 0x1dc   : > { %v892_v30 = vpop.f32.mrf.mxu1 }
 0x1dd   : > { %v893_v33 = vadd.f32 %v2152_v35, %v892_v30 }
 0x1df   : > { %v982_v36 = vmul.f32 %v893_v33, %v2093_v32  ;;  %vm950_vm5 = vcmp.gt.f32.partialorder %v893_v33, 0.0 }
 0x1e1   : > { %v1014_v39 = vsel %vm950_vm5, %v893_v33, %v982_v36 }
 0x1e2   : > { %v1038_v42 = vpack.c.bf16 %v1014_v39, %v1013_v38 }
 0x1e4   : > { %v895_v44 = vpop.f32.mrf.mxu1  ;;  %1158 = vmatmul.bf16.gmra.mxu2 %v1038_v42 }
 0x1e5   : > { %v896_v48 = vadd.f32 %v2152_v35, %v895_v44 }
 0x1e7   : > { %v983_v50 = vmul.f32 %v896_v48, %v2093_v32  ;;  %vm951_vm8 = vcmp.gt.f32.partialorder %v896_v48, 0.0 }
 0x1e9   : > { %v1015_v53 = vsel %vm951_vm8, %v896_v48, %v983_v50 }
 0x1ec   : > { %v897_v49 = vpop.f32.mrf.mxu1 }
 0x1ed   : > { %v898_v51 = vadd.f32 %v2152_v35, %v897_v49 }
 0x1ef   : > { %v984_v52 = vmul.f32 %v898_v51, %v2093_v32  ;;  %vm952_vm9 = vcmp.gt.f32.partialorder %v898_v51, 0.0 }
 0x1f1   : > { %v1016_v54 = vsel %vm952_vm9, %v898_v51, %v984_v52 }
 0x1f2   : > { %v1039_v55 = vpack.c.bf16 %v1016_v54, %v1015_v53 }
 0x1f4   : > { %v900_v56 = vpop.f32.mrf.mxu1  ;;  %1163 = vmatmul.bf16.gmra.mxu2 %v1039_v55 }
 0x1f5   : > { %v901_v60 = vadd.f32 %v2152_v35, %v900_v56 }
 0x1f7   : > { %v1124_v58 = vpop.f32.mrf.mxu2  ;;  %v985_v62 = vmul.f32 %v901_v60, %v2093_v32  ;;  %vm953_vm10 = vcmp.gt.f32.partialorder %v901_v60, 0.0 }
 0x1f8   : > { %v1125_v59 = vadd.f32 %v2222_v57, %v1124_v58 }
 0x1f9   : > { %v1017_v3 = vsel %vm953_vm10, %v901_v60, %v985_v62 }
 0x1fa   : > { %1204 = vst [vmem:[%s2226_s14] sm:$0xff] %v1125_v59 }
 0x1fc   : > { %v902_v61 = vpop.f32.mrf.mxu1 }
 0x1fd   : > { %v903_v63 = vadd.f32 %v2152_v35, %v902_v61 }
 0x1ff   : > { %v986_v0 = vmul.f32 %v903_v63, %v2093_v32  ;;  %v1126_v1 = vpop.f32.mrf.mxu2  ;;  %vm954_vm11 = vcmp.gt.f32.partialorder %v903_v63, 0.0 }
 0x200   : > { %v1127_v2 = vadd.f32 %v2222_v57, %v1126_v1 }
 0x201   : > { %v1018_v4 = vsel %vm954_vm11, %v903_v63, %v986_v0 }
 0x202   : > { %1205 = vst [vmem:[%s2226_s14 + $0x8] sm:$0xff] %v1127_v2  ;;  %v1040_v5 = vpack.c.bf16 %v1018_v4, %v1017_v3 }
 0x203   : > { %v1184_v38 = vpop.f32.mrf.mxu3 }
 0x204   : > { %v905_v6 = vpop.f32.mrf.mxu1  ;;  %1168 = vmatmul.bf16.gmra.mxu2 %v1040_v5  ;;  %v1185_v39 = vadd.f32 %v2222_v57, %v1184_v38 }
 0x205   : > { %v906_v9 = vadd.f32 %v2152_v35, %v905_v6 }
 0x206   : > { %1228 = vst [vmem:[%s2226_s14 + $0xc0] sm:$0xff] %v1185_v39 }
 0x207   : > { %v1129_v7 = vpop.f32.mrf.mxu2  ;;  %v987_v11 = vmul.f32 %v906_v9, %v2093_v32  ;;  %vm955_vm12 = vcmp.gt.f32.partialorder %v906_v9, 0.0 }
 0x208   : > { %v1130_v8 = vadd.f32 %v2222_v57, %v1129_v7 }
 0x209   : > { %v1019_v16 = vsel %vm955_vm12, %v906_v9, %v987_v11 }
 0x20a   : > { %1206 = vst [vmem:[%s2226_s14 + $0x10] sm:$0xff] %v1130_v8 }
 0x20b   : > { %v1186_v42 = vpop.f32.mrf.mxu3 }
 0x20c   : > { %v907_v10 = vpop.f32.mrf.mxu1  ;;  %v1187_v43 = vadd.f32 %v2222_v57, %v1186_v42 }
 0x20d   : > { %v908_v12 = vadd.f32 %v2152_v35, %v907_v10 }
 0x20e   : > { %1229 = vst [vmem:[%s2226_s14 + $0xc8] sm:$0xff] %v1187_v43 }
 0x20f   : > { %v988_v13 = vmul.f32 %v908_v12, %v2093_v32  ;;  %v1131_v14 = vpop.f32.mrf.mxu2  ;;  %vm956_vm13 = vcmp.gt.f32.partialorder %v908_v12, 0.0 }
 0x210   : > { %v1132_v15 = vadd.f32 %v2222_v57, %v1131_v14 }
 0x211   : > { %v1020_v17 = vsel %vm956_vm13, %v908_v12, %v988_v13 }
 0x212   : > { %1207 = vst [vmem:[%s2226_s14 + $0x18] sm:$0xff] %v1132_v15  ;;  %v1041_v18 = vpack.c.bf16 %v1020_v17, %v1019_v16 }
 0x213   : > { %v1189_v46 = vpop.f32.mrf.mxu3 }
 0x214   : > { %v910_v19 = vpop.f32.mrf.mxu1  ;;  %1173 = vmatmul.bf16.gmra.mxu2 %v1041_v18  ;;  %v1190_v47 = vadd.f32 %v2222_v57, %v1189_v46 }
 0x215   : > { %v911_v22 = vadd.f32 %v2152_v35, %v910_v19 }
 0x216   : > { %1230 = vst [vmem:[%s2226_s14 + $0xd0] sm:$0xff] %v1190_v47 }
 0x217   : > { %v1134_v20 = vpop.f32.mrf.mxu2  ;;  %v989_v24 = vmul.f32 %v911_v22, %v2093_v32  ;;  %vm957_vm14 = vcmp.gt.f32.partialorder %v911_v22, 0.0 }
 0x218   : > { %v1135_v21 = vadd.f32 %v2222_v57, %v1134_v20 }
 0x219   : > { %v1021_v29 = vsel %vm957_vm14, %v911_v22, %v989_v24 }
 0x21a   : > { %1208 = vst [vmem:[%s2226_s14 + $0x20] sm:$0xff] %v1135_v21 }
 0x21b   : > { %v1191_v50 = vpop.f32.mrf.mxu3 }
 0x21c   : > { %v912_v23 = vpop.f32.mrf.mxu1  ;;  %v1192_v51 = vadd.f32 %v2222_v57, %v1191_v50 }
 0x21d   : > { %v913_v25 = vadd.f32 %v2152_v35, %v912_v23 }
 0x21e   : > { %1231 = vst [vmem:[%s2226_s14 + $0xd8] sm:$0xff] %v1192_v51 }
 0x21f   : > { %v990_v26 = vmul.f32 %v913_v25, %v2093_v32  ;;  %v1136_v27 = vpop.f32.mrf.mxu2  ;;  %vm958_vm15 = vcmp.gt.f32.partialorder %v913_v25, 0.0 }
 0x220   : > { %v1137_v28 = vadd.f32 %v2222_v57, %v1136_v27 }
 0x221   : > { %v1022_v30 = vsel %vm958_vm15, %v913_v25, %v990_v26 }
 0x222   : > { %1209 = vst [vmem:[%s2226_s14 + $0x28] sm:$0xff] %v1137_v28  ;;  %v1042_v31 = vpack.c.bf16 %v1022_v30, %v1021_v29 }
 0x224   : > { %1178 = vmatmul.bf16.gmra.mxu2 %v1042_v31  ;;  %v1194_v54 = vpop.f32.mrf.mxu3 }
 0x225   : > { %v1195_v55 = vadd.f32 %v2222_v57, %v1194_v54 }
 0x227   : > { %v1139_v33 = vpop.f32.mrf.mxu2  ;;  %1232 = vst [vmem:[%s2226_s14 + $0xe0] sm:$0xff] %v1195_v55 }
 0x228   : > { %v1140_v34 = vadd.f32 %v2222_v57, %v1139_v33 }
 0x22a   : > { %1210 = vst [vmem:[%s2226_s14 + $0x30] sm:$0xff] %v1140_v34 }
 0x22c   : > { %v1196_v59 = vpop.f32.mrf.mxu3 }
 0x22d   : > { %v1197_v60 = vadd.f32 %v2222_v57, %v1196_v59 }
 0x22f   : > { %v1141_v35 = vpop.f32.mrf.mxu2  ;;  %1233 = vst [vmem:[%s2226_s14 + $0xe8] sm:$0xff] %v1197_v60 }
 0x230   : > { %v1142_v32 = vadd.f32 %v2222_v57, %v1141_v35 }
 0x232   : > { %1211 = vst [vmem:[%s2226_s14 + $0x38] sm:$0xff] %v1142_v32 }
 0x237   : > { %v1144_v36 = vpop.f32.mrf.mxu2 }
 0x238   : > { %v1145_v37 = vadd.f32 %v2222_v57, %v1144_v36 }
 0x23a   : > { %1212 = vst [vmem:[%s2226_s14 + $0x40] sm:$0xff] %v1145_v37 }
 0x23f   : > { %v1146_v40 = vpop.f32.mrf.mxu2  ;;  %v1199_v63 = vpop.f32.mrf.mxu3 }
 0x240   : > { %v1147_v41 = vadd.f32 %v2222_v57, %v1146_v40  ;;  %v1200_v0 = vadd.f32 %v2222_v57, %v1199_v63 }
 0x242   : > { %1213 = vst [vmem:[%s2226_s14 + $0x48] sm:$0xff] %v1147_v41 }
 0x243   : > { %1234 = vst [vmem:[%s2226_s14 + $0xf0] sm:$0xff] %v1200_v0 }
 0x247   : > { %v1149_v44 = vpop.f32.mrf.mxu2  ;;  %v1201_v3 = vpop.f32.mrf.mxu3 }
 0x248   : > { %v1150_v45 = vadd.f32 %v2222_v57, %v1149_v44  ;;  %v1202_v4 = vadd.f32 %v2222_v57, %v1201_v3 }
 0x24a   : > { %1214 = vst [vmem:[%s2226_s14 + $0x50] sm:$0xff] %v1150_v45 }
 0x24b   : > { %1235 = vst [vmem:[%s2226_s14 + $0xf8] sm:$0xff] %v1202_v4 }
 0x24f   : > { %v1151_v48 = vpop.f32.mrf.mxu2 }
 0x250   : > { %v1152_v49 = vadd.f32 %v2222_v57, %v1151_v48 }
 0x252   : > { %1215 = vst [vmem:[%s2226_s14 + $0x58] sm:$0xff] %v1152_v49 }
 0x257   : > { %v1154_v52 = vpop.f32.mrf.mxu2 }
 0x258   : > { %v1155_v53 = vadd.f32 %v2222_v57, %v1154_v52 }
 0x25a   : > { %1216 = vst [vmem:[%s2226_s14 + $0x60] sm:$0xff] %v1155_v53 }
 0x25f   : > { %v1156_v56 = vpop.f32.mrf.mxu2 }
 0x260   : > { %v1157_v58 = vadd.f32 %v2222_v57, %v1156_v56 }
 0x262   : > { %1217 = vst [vmem:[%s2226_s14 + $0x68] sm:$0xff] %v1157_v58 }
 0x267   : > { %v1159_v61 = vpop.f32.mrf.mxu2 }
 0x268   : > { %v1160_v62 = vadd.f32 %v2222_v57, %v1159_v61 }
 0x26a   : > { %1218 = vst [vmem:[%s2226_s14 + $0x70] sm:$0xff] %v1160_v62 }
 0x26f   : > { %v1161_v1 = vpop.f32.mrf.mxu2 }
 0x270   : > { %v1162_v2 = vadd.f32 %v2222_v57, %v1161_v1 }
 0x272   : > { %1219 = vst [vmem:[%s2226_s14 + $0x78] sm:$0xff] %v1162_v2 }
 0x277   : > { %v1164_v5 = vpop.f32.mrf.mxu2 }
 0x278   : > { %v1165_v6 = vadd.f32 %v2222_v57, %v1164_v5 }
 0x27a   : > { %1220 = vst [vmem:[%s2226_s14 + $0x80] sm:$0xff] %v1165_v6 }
 0x27f   : > { %v1166_v7 = vpop.f32.mrf.mxu2 }
 0x280   : > { %v1167_v8 = vadd.f32 %v2222_v57, %v1166_v7 }
 0x282   : > { %1221 = vst [vmem:[%s2226_s14 + $0x88] sm:$0xff] %v1167_v8 }
 0x287   : > { %v1169_v9 = vpop.f32.mrf.mxu2 }
 0x288   : > { %v1170_v10 = vadd.f32 %v2222_v57, %v1169_v9 }
 0x28a   : > { %1222 = vst [vmem:[%s2226_s14 + $0x90] sm:$0xff] %v1170_v10 }
 0x28f   : > { %v1171_v11 = vpop.f32.mrf.mxu2 }
 0x290   : > { %v1172_v12 = vadd.f32 %v2222_v57, %v1171_v11 }
 0x292   : > { %1223 = vst [vmem:[%s2226_s14 + $0x98] sm:$0xff] %v1172_v12 }
 0x297   : > { %v1174_v13 = vpop.f32.mrf.mxu2 }
 0x298   : > { %v1175_v14 = vadd.f32 %v2222_v57, %v1174_v13 }
 0x29a   : > { %1224 = vst [vmem:[%s2226_s14 + $0xa0] sm:$0xff] %v1175_v14 }
 0x29f   : > { %v1176_v15 = vpop.f32.mrf.mxu2 }
 0x2a0   : > { %v1177_v16 = vadd.f32 %v2222_v57, %v1176_v15 }
 0x2a2   : > { %1225 = vst [vmem:[%s2226_s14 + $0xa8] sm:$0xff] %v1177_v16 }
 0x2a7   : > { %v1179_v17 = vpop.f32.mrf.mxu2 }
 0x2a8   : > { %v1180_v18 = vadd.f32 %v2222_v57, %v1179_v17 }
 0x2aa   : > { %1226 = vst [vmem:[%s2226_s14 + $0xb0] sm:$0xff] %v1180_v18 }
 0x2af   : > { %v1181_v19 = vpop.f32.mrf.mxu2 }
 0x2b0   : > { %v1182_v20 = vadd.f32 %v2222_v57, %v1181_v19 }
 0x2b2   : > { %1227 = vst [vmem:[%s2226_s14 + $0xb8] sm:$0xff] %v1182_v20 }
 0x2b3   : > { %1831 = shalt.err (!%p1828_p10)
}
 0x2b4   : > { %s1885_s20 = smov 128   ;;  %s1886_s14 = smov 8  }
 0x2b5   : > { %1614 = dma.vmem_to_hbm [thread:$0]  (%p2026_p3), %s1250_s28, 4096, %s1252_s12, %s1237_s17, %s1885_s20, %s1885_s20, %s1886_s14  }
 0x2b6 PF: > { %s1266_s26 = sand.u32 1, %s1866_s29   ;;  %p2357_p12 = scmp.ge.s32.totalorder %s1878_s10, 2 }
 0x2b7   : > { %s1267_s16 = scalar_lea.sflag [#allocation5], %s1266_s26 }
 0x2b8   : > { %p1631_p13 = pnand %p2357_p12, %p1970_p6 }
 0x2ba   : > { %p1632_p0 = pneg %p1631_p13 }
 0x2bc   : > { %1861 = dma.done.wait (%p1632_p0), %s1267_s16, 4096  }
 0x2bd   : > { %1863 = vsyncadd (%p1632_p0), %s1267_s16, 4294963200  ;;  %p24_p5 = scmp.ge.s32.totalorder %s2008_s18, 4   ;;  %s2358_s29 = smov %s1870_s30 }
 0x2be   : > { %s2359_s30 = smov %s1874_s9  ;;  %s2360_s9 = smov %s2022_s22 }
 0x2bf   : > { %s2361_s10 = smov %s2008_s18  ;;  %26 = sbr.rel (!%p24_p5) target bundleno = 10 (0xa), region = 109 }
 0x2c4   :  { %1273 = vsyncpa [#allocation4], 1 }
 0x2c5   :  { %1275 = vsyncpa [#allocation4 + $0x1], 1 }
 0x2c6   :  { %1276 = vsyncpa [#allocation7], 1 }
 0x2c7   :  { %1277 = vsyncpa [#allocation10], 1 }
 0x2c8   :  { %1278 = vsyncpa [#allocation5], 1 }
 0x2c9   :  { %1280 = vsyncpa [#allocation5 + $0x1], 1 }

</bundles_post_ra>
